<compile_context>
chip_gen: v5e
topology: v5e:2x2
jax: 0.10.0
libtpu: 0.0.40
codegen_flags: <defaults>
</compile_context>

<pallas_src>
import functools

import jax
import jax.numpy as jnp
from jax.experimental import pallas as pl
from jax.experimental.pallas import tpu as pltpu

_LANE = 128
_TARGET_TILE_BYTES = 8 * 1024 * 1024     # VMEM footprint target per x tile buffer
_VMEM_LIMIT_BYTES = 32 * 1024 * 1024     # safe on v5e/v6e (128 MiB) and v7x (64 MiB)


def _round_up(value, multiple):
    return ((value + multiple - 1) // multiple) * multiple


def _choose_tiles(batch, input_dim, itemsize, target_bytes):
    """Pick (block_batch, block_k).

    The VMEM footprint of one (tb, tk) x tile is tb * round_up(tk, 128) * itemsize
    (the lane dim is padded to 128). Keep that near `target_bytes` so the
    ~0.35 us per-grid-step overhead is amortized, while 2x double-buffered tiles
    stay inside the scoped-VMEM limit.
    """
    padded_row = _round_up(input_dim, _LANE) * itemsize
    if padded_row * _LANE <= target_bytes:
        # No K split needed: even a 128-row tile of the full width fits the target.
        block_k = input_dim
        if batch * padded_row <= target_bytes:
            return batch, block_k                              # single tile, no padding
        block_batch = (target_bytes // padded_row) // _LANE * _LANE
        return max(_LANE, block_batch), block_k
    # Very wide rows: tile the reduction (K) axis too, 128 rows per tile.
    block_k = (target_bytes // (_LANE * itemsize)) // _LANE * _LANE
    block_k = max(_LANE, min(block_k, _round_up(input_dim, _LANE)))
    return _LANE, block_k


def _linear_kernel(x_ref, w_ref, b_ref, o_ref, *, input_dim, block_k):
    # x_ref: [TB, TK] (input dtype)   w_ref: [8, TK] (input dtype, rows identical)
    # b_ref: [1] f32 in SMEM          o_ref: [1, TB] f32 (resident across the K axis)
    k = pl.program_id(1)

    x = x_ref[...]
    w = w_ref[...]

    if input_dim % block_k != 0:
        # Partial last K block: zero out-of-range columns so OOB garbage
        # (possibly NaN/Inf) cannot pollute the accumulation. This branch is
        # statically skipped whenever block_k divides input_dim.
        base = k * block_k
        xcol = base + jax.lax.broadcasted_iota(jnp.int32, x.shape, 1)
        x = jnp.where(xcol < input_dim, x, jnp.zeros_like(x))
        wcol = base + jax.lax.broadcasted_iota(jnp.int32, w.shape, 1)
        w = jnp.where(wcol < input_dim, w, jnp.zeros_like(w))

    # MXU GEMV producing a lane-dense row: partial[m, n] = sum_d w[m, d] * x[n, d].
    partial = jax.lax.dot_general(
        w, x,
        dimension_numbers=(((1,), (1,)), ((), ())),
        preferred_element_type=jnp.float32,
    )                                                  # [8, TB] f32 (rows identical)

    @pl.when(k == 0)
    def _init():
        o_ref[...] = jnp.zeros_like(o_ref)

    o_ref[...] += partial[0:1, :]

    @pl.when(k == pl.num_programs(1) - 1)
    def _finalize():
        o_ref[...] += b_ref[0]


def linear_demand_predictor(x, weight, bias, *, block_bytes=None):
    """Forward pass of nn.Linear(input_dim, 1): returns x @ weight.T + bias.

    Args:
      x:      [batch, input_dim], float32 or bfloat16.
      weight: [1, input_dim] (PyTorch nn.Linear weight layout) or [input_dim].
      bias:   [1] (or scalar).
      block_bytes: optional override of the per-tile VMEM byte target (testing).
    Returns:
      [batch, 1] float32.
    """
    batch, input_dim = x.shape
    # Weight replicated to 8 sublanes (lane-dense, MXU-friendly); dtype follows x.
    w = jnp.broadcast_to(jnp.asarray(weight).reshape(1, input_dim), (8, input_dim))
    w = w.astype(x.dtype)
    b = jnp.asarray(bias).reshape(1).astype(jnp.float32)

    target = _TARGET_TILE_BYTES if block_bytes is None else block_bytes
    tb, tk = _choose_tiles(batch, input_dim, jnp.dtype(x.dtype).itemsize, target)
    num_bt = pl.cdiv(batch, tb)
    num_k = pl.cdiv(input_dim, tk)
    padded_batch = num_bt * tb

    kernel = functools.partial(_linear_kernel, input_dim=input_dim, block_k=tk)

    out_row = pl.pallas_call(
        kernel,
        out_shape=jax.ShapeDtypeStruct((1, padded_batch), jnp.float32),
        grid_spec=pltpu.PrefetchScalarGridSpec(
            num_scalar_prefetch=0,
            grid=(num_bt, num_k),                      # reduction axis (K) last
            in_specs=[
                # x: (tb, tk) tiles, auto double-buffered / pipelined (dominant stream).
                pl.BlockSpec((tb, tk), lambda i, k: (i, k)),
                # weight: only the K block changes; stays VMEM-resident across i.
                pl.BlockSpec((8, tk), lambda i, k: (0, k)),
                # bias: tiny array in SMEM, read as a scalar.
                pl.BlockSpec(memory_space=pltpu.MemorySpace.SMEM),
            ],
            # Lane-dense output row; same block across K -> acts as the accumulator.
            out_specs=pl.BlockSpec((1, tb), lambda i, k: (0, i)),
        ),
        compiler_params=pltpu.CompilerParams(
            dimension_semantics=("parallel", "arbitrary"),
            vmem_limit_bytes=_VMEM_LIMIT_BYTES,
        ),
    )(x, w, b)

    # (1, padded_batch) row -> (batch, 1) column (tiny wrapper-side reshape).
    return out_row.reshape(-1)[:batch].reshape(batch, 1)


if __name__ == "__main__":
    key = jax.random.PRNGKey(0)
    k_x1, k_w1, k_b1, k_x2, k_w2 = jax.random.split(key, 5)

    # 1) Primary check: small batch of feature rows (module's default path).
    batch, input_dim = 8, 32
    bound = 1.0 / jnp.sqrt(jnp.float32(input_dim))
    weight = jax.random.uniform(k_w1, (1, input_dim), jnp.float32, -bound, bound)
    bias = jax.random.uniform(k_b1, (1,), jnp.float32, -bound, bound)
    x = jax.random.normal(k_x1, (batch, input_dim), jnp.float32)

    out = jax.block_until_ready(linear_demand_predictor(x, weight, bias))
    ref = x @ weight.T + bias
    assert out.shape == (batch, 1), out.shape
    # MXU f32 matmuls may apply bf16-pass rounding -> compare with a loose-ish tol.
    assert jnp.allclose(out, ref, atol=2e-2, rtol=2e-2), "f32 mismatch vs reference"

    # 2) Tiling check: tiny forced blocks exercise the multi-tile batch axis, the
    #    K reduction axis, and partial-block masking (batch=272, input_dim=160).
    b2, d2 = 272, 160
    bound2 = 1.0 / jnp.sqrt(jnp.float32(d2))
    w2 = jax.random.uniform(k_w2, (1, d2), jnp.float32, -bound2, bound2)
    x2 = jax.random.normal(k_x2, (b2, d2), jnp.float32)
    out2 = jax.block_until_ready(
        linear_demand_predictor(x2, w2, bias, block_bytes=128 * 128 * 4))
    ref2 = x2 @ w2.T + bias
    assert out2.shape == (b2, 1), out2.shape
    assert jnp.allclose(out2, ref2, atol=5e-2, rtol=5e-2), "tiled mismatch vs reference"

    # 3) bf16 activations (MXU path, f32 accumulation).
    xb = x.astype(jnp.bfloat16)
    outb = jax.block_until_ready(linear_demand_predictor(xb, weight, bias))
    wb = weight.astype(jnp.bfloat16).astype(jnp.float32)
    refb = xb.astype(jnp.float32) @ wb.T + bias
    assert jnp.allclose(outb, refb, atol=2e-3, rtol=2e-3), "bf16 mismatch vs reference"

    print("KERNEL_OK")
</pallas_src>

<mosaic_0001>
module attributes {stable_mosaic.version = 11 : i64} {
  func.func @_linear_kernel(%arg0: i32, %arg1: i32, %arg2: memref<8x32xf32, #tpu.memory_space<vmem>>, %arg3: memref<8x32xf32, #tpu.memory_space<vmem>>, %arg4: memref<1xf32, #tpu.memory_space<smem>>, %arg5: memref<1x8xf32, #tpu.memory_space<vmem>>) attributes {dimension_semantics = [#tpu.dimension_semantics<parallel>, #tpu.dimension_semantics<arbitrary>], iteration_bounds = array<i64: 1, 1>, scalar_prefetch = 0 : i64, scratch_operands = 0 : i64, tpu.core_type = #tpu.core_type<tc>, window_params = [{transform_indices = @transform_0, window_bounds = array<i64: 8, 32>}, {transform_indices = @transform_1, window_bounds = array<i64: 8, 32>}, {transform_indices = @transform_2, window_bounds = array<i64: 1>}, {transform_indices = @transform_3, window_bounds = array<i64: 1, 8>}]} {
    %c0 = arith.constant 0 : index
    %c0_0 = arith.constant 0 : index
    %0 = vector.load %arg2[%c0, %c0_0] : memref<8x32xf32, #tpu.memory_space<vmem>>, vector<8x32xf32>
    %c0_1 = arith.constant 0 : index
    %c0_2 = arith.constant 0 : index
    %1 = vector.load %arg3[%c0_1, %c0_2] : memref<8x32xf32, #tpu.memory_space<vmem>>, vector<8x32xf32>
    %cst = arith.constant dense<0.000000e+00> : vector<8x8xf32>
    %2 = tpu.matmul %1, %0, %cst {dimension_numbers = #tpu.dot_dimension_numbers<[1], [1], [0], [0], [0, 0, 1, 0], [], []>} : vector<8x32xf32>, vector<8x32xf32>, vector<8x8xf32> -> vector<8x8xf32>
    %c0_i32 = arith.constant 0 : i32
    %3 = arith.cmpi eq, %arg1, %c0_i32 : i32
    %4 = arith.extui %3 : i1 to i32
    %c0_i32_3 = arith.constant 0 : i32
    %5 = arith.cmpi ne, %4, %c0_i32_3 : i32
    scf.if %5 {
      %cst_10 = arith.constant 0.000000e+00 : f32
      %13 = vector.broadcast %cst_10 : f32 to vector<1x8xf32>
      %c0_11 = arith.constant 0 : index
      %c0_12 = arith.constant 0 : index
      %14 = vector.load %arg5[%c0_11, %c0_12] : memref<1x8xf32, #tpu.memory_space<vmem>>, vector<1x8xf32>
      tpu.vector_store %arg5[%c0_11, %c0_12], %13 {strides = array<i32>} : memref<1x8xf32, #tpu.memory_space<vmem>>, vector<1x8xf32>,
    } else {
    }
    %c0_4 = arith.constant 0 : index
    %c0_5 = arith.constant 0 : index
    %6 = vector.load %arg5[%c0_4, %c0_5] : memref<1x8xf32, #tpu.memory_space<vmem>>, vector<1x8xf32>
    %7 = vector.extract_strided_slice %2 {offsets = [0, 0], sizes = [1, 8], strides = [1, 1]} : vector<8x8xf32> to vector<1x8xf32>
    %8 = arith.addf %6, %7 : vector<1x8xf32>
    %c0_6 = arith.constant 0 : index
    %c0_7 = arith.constant 0 : index
    %9 = vector.load %arg5[%c0_6, %c0_7] : memref<1x8xf32, #tpu.memory_space<vmem>>, vector<1x8xf32>
    tpu.vector_store %arg5[%c0_6, %c0_7], %8 {strides = array<i32>} : memref<1x8xf32, #tpu.memory_space<vmem>>, vector<1x8xf32>,
    %c0_i32_8 = arith.constant 0 : i32
    %10 = arith.cmpi eq, %arg1, %c0_i32_8 : i32
    %11 = arith.extui %10 : i1 to i32
    %c0_i32_9 = arith.constant 0 : i32
    %12 = arith.cmpi ne, %11, %c0_i32_9 : i32
    scf.if %12 {
      %c0_10 = arith.constant 0 : index
      %c0_11 = arith.constant 0 : index
      %13 = vector.load %arg5[%c0_10, %c0_11] : memref<1x8xf32, #tpu.memory_space<vmem>>, vector<1x8xf32>
      %c0_12 = arith.constant 0 : index
      %14 = memref.load %arg4[%c0_12] : memref<1xf32, #tpu.memory_space<smem>>
      %15 = vector.broadcast %14 : f32 to vector<1x8xf32>
      %16 = arith.addf %13, %15 : vector<1x8xf32>
      %c0_13 = arith.constant 0 : index
      %c0_14 = arith.constant 0 : index
      %17 = vector.load %arg5[%c0_13, %c0_14] : memref<1x8xf32, #tpu.memory_space<vmem>>, vector<1x8xf32>
      tpu.vector_store %arg5[%c0_13, %c0_14], %16 {strides = array<i32>} : memref<1x8xf32, #tpu.memory_space<vmem>>, vector<1x8xf32>,
    } else {
    }
    return
  }
  func.func @transform_0(%arg0: i32, %arg1: i32) -> (i32, i32) {
    %c0_i32 = arith.constant 0 : i32
    return %arg0, %arg1 : i32, i32
  }
  func.func @transform_1(%arg0: i32, %arg1: i32) -> (i32, i32) {
    %c0_i32 = arith.constant 0 : i32
    %c0_i32_0 = arith.constant 0 : i32
    return %c0_i32, %arg1 : i32, i32
  }
  func.func @transform_2(%arg0: i32, %arg1: i32) -> i32 {
    %c0_i32 = arith.constant 0 : i32
    %c0_i32_0 = arith.constant 0 : i32
    return %c0_i32 : i32
  }
  func.func @transform_3(%arg0: i32, %arg1: i32) -> (i32, i32) {
    %c0_i32 = arith.constant 0 : i32
    %c0_i32_0 = arith.constant 0 : i32
    return %c0_i32, %arg0 : i32, i32
  }
}

</mosaic_0001>

<bundles_post_ra>
// kernel: tpu_custom_call.1
= control target key start
LH: loop header
LB: loop body
LE: loop exit
PB: predicated region body
PF: predicated region fallthrough
CT: control target
= control target key end

     0   :  { %9 = vsyncpa [#allocation4], 0  ;;  %s229_s0 = inlined_call_operand.hbm [shape: f32[8,32], index: 0, kind: input, shape index: {}]   ;;  %s230_s1 = inlined_call_operand.hbm [shape: f32[8,32], index: 1, kind: input, shape index: {}]   ;;  %s231_s2 = inlined_call_operand.<no memory space> [shape: f32[1], index: 2, kind: input, shape index: {}]   ;;  %s232_s3 = inlined_call_operand.hbm [shape: f32[1,8], index: 3, kind: output, shape index: {}]  }
   0x1   :  { %10 = vsyncpa [#allocation7], 0 }
   0x2   :  { %11 = vsyncpa [#allocation5], 0  ;;  %s17_s14 = sshll.u32 %s229_s0, 4  ;;  %s193_s15 = smov [#allocation3]   ;;  %s18_s14 = int_to_ptr.hbm [resolvable:$true] %s17_s14 }
   0x3   :  { %s19_s16 = sshll.u32 %s193_s15, 4  ;;  %s28_s19 = sshll.u32 %s230_s1, 4  ;;  %s20_s16 = int_to_ptr.vmem [resolvable:$true] %s19_s16  ;;  %s29_s19 = int_to_ptr.hbm [resolvable:$true] %s28_s19 }
   0x4   :  { %22 = dma.hbm_to_vmem [thread:$0]  %s18_s14, 128, %s20_s16, [#allocation4]  }
   0x5   :  { %s194_s20 = smov [#allocation6]  }
   0x6   :  { %s30_s21 = sshll.u32 %s194_s20, 4  ;;  %s31_s21 = int_to_ptr.vmem [resolvable:$true] %s30_s21 }
   0x7   :  { %33 = dma.hbm_to_vmem [thread:$0]  %s29_s19, 128, %s31_s21, [#allocation7]  }
   0x8   :  { %187 = dma.done.wait [#allocation4], 128  }
   0x9   :  { %188 = vsyncadd [#allocation4], 4294967168 }
   0xa   :  { %189 = dma.done.wait [#allocation7], 128  }
   0xb   :  { %190 = vsyncadd [#allocation7], 4294967168  ;;  %vm46_vm0 = vcmask 261120   ;;  %v44_v0 = vld [vmem:[#allocation3] sm:$0xff]  ;;  %v45_v1 = vld [vmem:[#allocation6] sm:$0xff]  ;;  %vm77_vm1 = vcmask 57344   ;;  %v88_v6 = vstv %s231_s2 }
   0xc   :  { %109 = vmatpush.xpose.msk.msra.mxu0 %vm46_vm0, %v44_v0  ;;  %v195_v2 = vmov 0.0   ;;  %s196_s22 = smov [#allocation8]   ;;  %s98_s26 = sshll.u32 %s232_s3, 4  ;;  %s99_s26 = int_to_ptr.hbm [resolvable:$true] %s98_s26 }
   0xd   :  { %78 = vst.msk [vmem:[#allocation8] sm:$0x1] %vm77_vm1, %v195_v2  ;;  %s96_s23 = sshll.u32 %s196_s22, 4  ;;  %s97_s23 = int_to_ptr.vmem [resolvable:$true] %s96_s23 }
   0xf   :  { %110 = vmatmul.msk.f32.vlgmr.msra.gmra.mxu0 %vm46_vm0, %v45_v1 }
  0x14   :  { %v79_v3 = vld [vmem:[#allocation8] sm:$0x1] }
  0x8c   :  { %v70_v4 = vpop.f32.mrf.mxu0 }
  0x8d   :  { %v80_v5 = vadd.f32 %v79_v3, %v70_v4 }
  0x8f   :  { %82 = vst.msk [vmem:[#allocation8] sm:$0x1] %vm77_vm1, %v80_v5 }
  0x96   :  { %v86_v7 = vld [vmem:[#allocation8] sm:$0x1] }
  0x97   :  { %v89_v8 = vadd.f32 %v88_v6, %v86_v7 }
  0x99   :  { %90 = vst.msk [vmem:[#allocation8] sm:$0x1] %vm77_vm1, %v89_v8 }
  0x9a   :  { %101 = dma.vmem_to_hbm [thread:$0]  %s97_s23, 16, %s99_s26, [#allocation5]  }
  0x9b   :  { %191 = dma.done.wait [#allocation5], 16  }
  0x9c   :  { %192 = vsyncadd [#allocation5], 4294967280 }
  0x9d   :  { %106 = vsyncpa [#allocation4], 1 }
  0x9e   :  { %107 = vsyncpa [#allocation7], 1 }
  0x9f   :  { %108 = vsyncpa [#allocation5], 1 }

</bundles_post_ra>
